<compile_context>
chip_gen: v5e
topology: v5e:2x2
jax: 0.10.0
libtpu: 0.0.40
codegen_flags: <defaults>
</compile_context>

<pallas_src>
import jax
import jax.numpy as jnp
from jax.experimental import pallas as pl
from jax.experimental.pallas import tpu as pltpu

SOBEL_2D = jnp.array([[1.0, 0.0, -1.0],
                      [2.0, 0.0, -2.0],
                      [1.0, 0.0, -1.0]], dtype=jnp.float32)
SOBEL_FILTER = jnp.broadcast_to(SOBEL_2D, (3, 3, 3, 3))   # (out_c, in_c, kh, kw)


def _batch_block(n, bytes_per_item, target_bytes=2 * 1024 * 1024, max_block=32):
    """Batch items per grid step: large enough to amortize the ~600-cycle
    per-step overhead, small enough for VMEM, and leaving >=2 grid steps so
    both v7x TensorCores get work.  Must divide n exactly so the min/max
    reductions never see padded garbage rows."""
    bt = max(1, min(n, target_bytes // max(bytes_per_item, 1), max_block))
    if n >= 2:
        bt = max(1, min(bt, n // 2))
    while n % bt:
        bt -= 1
    return bt


def _sobel_minmax_kernel(img_ref, mag_ref, pmin_ref, pmax_ref):
    x = img_ref[...].astype(jnp.float32)            # (Bt, C, H, W)
    bt, _, h, w = x.shape
    s = jnp.sum(x, axis=1)                          # (Bt, H, W): channel sum

    zrow = jnp.zeros((bt, 1, w), jnp.float32)
    zcol = jnp.zeros((bt, h, 1), jnp.float32)

    # Separable Sobel: 6 single-step zero-edge shifts instead of 12 taps off an
    # (H+2, W+2) zero-padded copy.
    # NOTE: shifts use slice+concat rather than pltpu.roll + iota masks: with
    # W=16 (< the 128-lane tile) sub-tile lane rotates are a Mosaic lowering
    # risk, and at these sizes the kernel is HBM/overhead bound, so the shift
    # flavour is off the critical path.
    s_up = jnp.concatenate([zrow, s[:, :-1, :]], axis=1)     # s[y-1, x]
    s_dn = jnp.concatenate([s[:, 1:, :], zrow], axis=1)      # s[y+1, x]
    a = s_up + 2.0 * s + s_dn                                # vertical [1,2,1]
    b = s_up - s_dn                                          # vertical [1,0,-1]
    a_l = jnp.concatenate([zcol, a[:, :, :-1]], axis=2)      # a[y, x-1]
    a_r = jnp.concatenate([a[:, :, 1:], zcol], axis=2)       # a[y, x+1]
    b_l = jnp.concatenate([zcol, b[:, :, :-1]], axis=2)
    b_r = jnp.concatenate([b[:, :, 1:], zcol], axis=2)

    g_x = a_l - a_r
    g_y = b_l + 2.0 * b + b_r
    mag = jnp.sqrt(g_x * g_x + g_y * g_y)                    # (Bt, H, W)
    mag_ref[...] = mag.astype(mag_ref.dtype)

    mn = jnp.min(jnp.min(mag, axis=2, keepdims=True), axis=1, keepdims=True)
    mx = jnp.max(jnp.max(mag, axis=2, keepdims=True), axis=1, keepdims=True)
    pmin_ref[...] = jnp.min(mn, axis=0, keepdims=True)       # (1, 1, 1)
    pmax_ref[...] = jnp.max(mx, axis=0, keepdims=True)


def _normalize_kernel(mag_ref, mm_ref, out_ref):
    mn = mm_ref[0]                                           # SMEM scalars
    scale = mm_ref[1]                                        # 1 / (max - min)
    y = (mag_ref[...] - mn) * scale                          # (Bt, H, W)
    # Channel broadcast happens here (leading-dim broadcast: layout preserving,
    # no relayout), writing straight into the NCHW output block.
    out_ref[...] = jnp.broadcast_to(y[:, None, :, :],
                                    out_ref.shape).astype(out_ref.dtype)


@jax.jit
def sobel_edge(img):
    n, c, h, w = img.shape
    bt = _batch_block(n, (c + 1) * h * w * 4)
    g = n // bt
    cparams = pltpu.CompilerParams(
        dimension_semantics=("parallel",),
        vmem_limit_bytes=32 * 1024 * 1024,
    )

    # TODO(synk): for very large H*W a single image (plus f32 temps) no longer
    # fits the v7x 64 MiB VMEM budget; tile H into row strips with a 1-row halo.
    mag, pmin, pmax = pl.pallas_call(
        _sobel_minmax_kernel,
        out_shape=(
            jax.ShapeDtypeStruct((n, h, w), jnp.float32),    # 1-channel mag
            jax.ShapeDtypeStruct((g, 1, 1), jnp.float32),
            jax.ShapeDtypeStruct((g, 1, 1), jnp.float32),
        ),
        grid=(g,),
        in_specs=[pl.BlockSpec((bt, c, h, w), lambda i: (i, 0, 0, 0))],
        out_specs=(
            pl.BlockSpec((bt, h, w), lambda i: (i, 0, 0)),
            pl.BlockSpec((1, 1, 1), lambda i: (i, 0, 0)),
            pl.BlockSpec((1, 1, 1), lambda i: (i, 0, 0)),
        ),
        compiler_params=cparams,
    )(img)

    # Glue: global min and a precomputed reciprocal scale via SMEM, so the
    # normalize body is a 2-op (sub, mul) VPU stream with no per-element divide.
    mn = jnp.min(pmin)
    mx = jnp.max(pmax)
    mm = jnp.stack([mn, 1.0 / (mx - mn)]).astype(jnp.float32)   # (2,)

    out = pl.pallas_call(
        _normalize_kernel,
        out_shape=jax.ShapeDtypeStruct((n, c, h, w), jnp.float32),
        grid=(g,),
        in_specs=[
            pl.BlockSpec((bt, h, w), lambda i: (i, 0, 0)),
            pl.BlockSpec(memory_space=pltpu.MemorySpace.SMEM),
        ],
        out_specs=pl.BlockSpec((bt, c, h, w), lambda i: (i, 0, 0, 0)),
        compiler_params=cparams,
    )(mag, mm)
    return out


def _reference(img):
    dn = ("NCHW", "OIHW", "NCHW")
    gx = jax.lax.conv_general_dilated(img, SOBEL_FILTER, (1, 1), "SAME",
                                      dimension_numbers=dn)
    gy = jax.lax.conv_general_dilated(img, jnp.swapaxes(SOBEL_FILTER, -1, -2),
                                      (1, 1), "SAME", dimension_numbers=dn)
    mag = jnp.sqrt(gx ** 2 + gy ** 2)
    return (mag - mag.min()) / (mag.max() - mag.min())


if __name__ == "__main__":
    key = jax.random.PRNGKey(0)
    img = jax.random.normal(key, (2, 3, 16, 16), dtype=jnp.float32)

    out = sobel_edge(img)
    jax.block_until_ready(out)

    ref = _reference(img)
    assert out.shape == (2, 3, 16, 16) and out.dtype == jnp.float32
    assert jnp.allclose(out, ref, atol=1e-5, rtol=1e-5), \
        float(jnp.max(jnp.abs(out - ref)))
    print("KERNEL_OK")
</pallas_src>

<mosaic_0001>
module attributes {stable_mosaic.version = 11 : i64} {
  func.func @_sobel_minmax_kernel(%arg0: i32, %arg1: memref<1x3x16x16xf32, #tpu.memory_space<vmem>>, %arg2: memref<1x16x16xf32, #tpu.memory_space<vmem>>, %arg3: memref<1x1x1xf32, #tpu.memory_space<vmem>>, %arg4: memref<1x1x1xf32, #tpu.memory_space<vmem>>) attributes {dimension_semantics = [#tpu.dimension_semantics<parallel>], iteration_bounds = array<i64: 2>, scalar_prefetch = 0 : i64, scratch_operands = 0 : i64, tpu.core_type = #tpu.core_type<tc>, window_params = [{transform_indices = @transform_0, window_bounds = array<i64: 1, 3, 16, 16>}, {transform_indices = @transform_1, window_bounds = array<i64: 1, 16, 16>}, {transform_indices = @transform_2, window_bounds = array<i64: 1, 1, 1>}, {transform_indices = @transform_3, window_bounds = array<i64: 1, 1, 1>}]} {
    %c0 = arith.constant 0 : index
    %c0_0 = arith.constant 0 : index
    %c0_1 = arith.constant 0 : index
    %c0_2 = arith.constant 0 : index
    %0 = vector.load %arg1[%c0, %c0_0, %c0_1, %c0_2] : memref<1x3x16x16xf32, #tpu.memory_space<vmem>>, vector<1x3x16x16xf32>
    %cst = arith.constant dense<0.000000e+00> : vector<1x16x16xf32>
    %1 = vector.multi_reduction <add>, %0, %cst [1] : vector<1x3x16x16xf32> to vector<1x16x16xf32>
    %cst_3 = arith.constant 0.000000e+00 : f32
    %2 = vector.broadcast %cst_3 : f32 to vector<1x1x16xf32>
    %cst_4 = arith.constant 0.000000e+00 : f32
    %3 = vector.broadcast %cst_4 : f32 to vector<1x16x1xf32>
    %4 = vector.extract_strided_slice %1 {offsets = [0, 0, 0], sizes = [1, 15, 16], strides = [1, 1, 1]} : vector<1x16x16xf32> to vector<1x15x16xf32>
    %5 = tpu.concatenate %2, %4 in 1 : vector<1x1x16xf32>, vector<1x15x16xf32> -> vector<1x16x16xf32>
    %6 = vector.extract_strided_slice %1 {offsets = [0, 1, 0], sizes = [1, 15, 16], strides = [1, 1, 1]} : vector<1x16x16xf32> to vector<1x15x16xf32>
    %7 = tpu.concatenate %6, %2 in 1 : vector<1x15x16xf32>, vector<1x1x16xf32> -> vector<1x16x16xf32>
    %cst_5 = arith.constant 2.000000e+00 : f32
    %8 = vector.broadcast %cst_5 : f32 to vector<1x16x16xf32>
    %9 = arith.mulf %8, %1 : vector<1x16x16xf32>
    %10 = arith.addf %5, %9 : vector<1x16x16xf32>
    %11 = arith.addf %10, %7 : vector<1x16x16xf32>
    %12 = arith.subf %5, %7 : vector<1x16x16xf32>
    %13 = vector.extract_strided_slice %11 {offsets = [0, 0, 0], sizes = [1, 16, 15], strides = [1, 1, 1]} : vector<1x16x16xf32> to vector<1x16x15xf32>
    %14 = tpu.concatenate %3, %13 in 2 : vector<1x16x1xf32>, vector<1x16x15xf32> -> vector<1x16x16xf32>
    %15 = vector.extract_strided_slice %11 {offsets = [0, 0, 1], sizes = [1, 16, 15], strides = [1, 1, 1]} : vector<1x16x16xf32> to vector<1x16x15xf32>
    %16 = tpu.concatenate %15, %3 in 2 : vector<1x16x15xf32>, vector<1x16x1xf32> -> vector<1x16x16xf32>
    %17 = vector.extract_strided_slice %12 {offsets = [0, 0, 0], sizes = [1, 16, 15], strides = [1, 1, 1]} : vector<1x16x16xf32> to vector<1x16x15xf32>
    %18 = tpu.concatenate %3, %17 in 2 : vector<1x16x1xf32>, vector<1x16x15xf32> -> vector<1x16x16xf32>
    %19 = vector.extract_strided_slice %12 {offsets = [0, 0, 1], sizes = [1, 16, 15], strides = [1, 1, 1]} : vector<1x16x16xf32> to vector<1x16x15xf32>
    %20 = tpu.concatenate %19, %3 in 2 : vector<1x16x15xf32>, vector<1x16x1xf32> -> vector<1x16x16xf32>
    %21 = arith.subf %14, %16 : vector<1x16x16xf32>
    %cst_6 = arith.constant 2.000000e+00 : f32
    %22 = vector.broadcast %cst_6 : f32 to vector<1x16x16xf32>
    %23 = arith.mulf %22, %12 : vector<1x16x16xf32>
    %24 = arith.addf %18, %23 : vector<1x16x16xf32>
    %25 = arith.addf %24, %20 : vector<1x16x16xf32>
    %26 = arith.mulf %21, %21 : vector<1x16x16xf32>
    %27 = arith.mulf %25, %25 : vector<1x16x16xf32>
    %28 = arith.addf %26, %27 : vector<1x16x16xf32>
    %29 = math.sqrt %28 : vector<1x16x16xf32>
    %c0_7 = arith.constant 0 : index
    %c0_8 = arith.constant 0 : index
    %c0_9 = arith.constant 0 : index
    %30 = vector.load %arg2[%c0_7, %c0_8, %c0_9] : memref<1x16x16xf32, #tpu.memory_space<vmem>>, vector<1x16x16xf32>
    tpu.vector_store %arg2[%c0_7, %c0_8, %c0_9], %29 {strides = array<i32>} : memref<1x16x16xf32, #tpu.memory_space<vmem>>, vector<1x16x16xf32>,
    %cst_10 = arith.constant dense<0x7F800000> : vector<1x16xf32>
    %31 = vector.multi_reduction <minimumf>, %29, %cst_10 [2] : vector<1x16x16xf32> to vector<1x16xf32>
    %32 = vector.shape_cast %31 : vector<1x16xf32> to vector<1x16x1xf32>
    %cst_11 = arith.constant dense<0x7F800000> : vector<1x1xf32>
    %33 = vector.multi_reduction <minimumf>, %32, %cst_11 [1] : vector<1x16x1xf32> to vector<1x1xf32>
    %34 = vector.shape_cast %33 : vector<1x1xf32> to vector<1x1x1xf32>
    %cst_12 = arith.constant dense<0xFF800000> : vector<1x16xf32>
    %35 = vector.multi_reduction <maximumf>, %29, %cst_12 [2] : vector<1x16x16xf32> to vector<1x16xf32>
    %36 = vector.shape_cast %35 : vector<1x16xf32> to vector<1x16x1xf32>
    %cst_13 = arith.constant dense<0xFF800000> : vector<1x1xf32>
    %37 = vector.multi_reduction <maximumf>, %36, %cst_13 [1] : vector<1x16x1xf32> to vector<1x1xf32>
    %38 = vector.shape_cast %37 : vector<1x1xf32> to vector<1x1x1xf32>
    %cst_14 = arith.constant dense<0x7F800000> : vector<1x1xf32>
    %39 = vector.multi_reduction <minimumf>, %34, %cst_14 [0] : vector<1x1x1xf32> to vector<1x1xf32>
    %40 = vector.shape_cast %39 : vector<1x1xf32> to vector<1x1x1xf32>
    %c0_15 = arith.constant 0 : index
    %c0_16 = arith.constant 0 : index
    %c0_17 = arith.constant 0 : index
    %41 = vector.load %arg3[%c0_15, %c0_16, %c0_17] : memref<1x1x1xf32, #tpu.memory_space<vmem>>, vector<1x1x1xf32>
    tpu.vector_store %arg3[%c0_15, %c0_16, %c0_17], %40 {strides = array<i32>} : memref<1x1x1xf32, #tpu.memory_space<vmem>>, vector<1x1x1xf32>,
    %cst_18 = arith.constant dense<0xFF800000> : vector<1x1xf32>
    %42 = vector.multi_reduction <maximumf>, %38, %cst_18 [0] : vector<1x1x1xf32> to vector<1x1xf32>
    %43 = vector.shape_cast %42 : vector<1x1xf32> to vector<1x1x1xf32>
    %c0_19 = arith.constant 0 : index
    %c0_20 = arith.constant 0 : index
    %c0_21 = arith.constant 0 : index
    %44 = vector.load %arg4[%c0_19, %c0_20, %c0_21] : memref<1x1x1xf32, #tpu.memory_space<vmem>>, vector<1x1x1xf32>
    tpu.vector_store %arg4[%c0_19, %c0_20, %c0_21], %43 {strides = array<i32>} : memref<1x1x1xf32, #tpu.memory_space<vmem>>, vector<1x1x1xf32>,
    return
  }
  func.func @transform_0(%arg0: i32) -> (i32, i32, i32, i32) {
    %c0_i32 = arith.constant 0 : i32
    %c0_i32_0 = arith.constant 0 : i32
    %c0_i32_1 = arith.constant 0 : i32
    %c0_i32_2 = arith.constant 0 : i32
    return %arg0, %c0_i32, %c0_i32_0, %c0_i32_1 : i32, i32, i32, i32
  }
  func.func @transform_1(%arg0: i32) -> (i32, i32, i32) {
    %c0_i32 = arith.constant 0 : i32
    %c0_i32_0 = arith.constant 0 : i32
    %c0_i32_1 = arith.constant 0 : i32
    return %arg0, %c0_i32, %c0_i32_0 : i32, i32, i32
  }
  func.func @transform_2(%arg0: i32) -> (i32, i32, i32) {
    %c0_i32 = arith.constant 0 : i32
    %c0_i32_0 = arith.constant 0 : i32
    %c0_i32_1 = arith.constant 0 : i32
    return %arg0, %c0_i32, %c0_i32_0 : i32, i32, i32
  }
  func.func @transform_3(%arg0: i32) -> (i32, i32, i32) {
    %c0_i32 = arith.constant 0 : i32
    %c0_i32_0 = arith.constant 0 : i32
    %c0_i32_1 = arith.constant 0 : i32
    return %arg0, %c0_i32, %c0_i32_0 : i32, i32, i32
  }
}

module attributes {stable_mosaic.version = 11 : i64} {
  func.func @_normalize_kernel(%arg0: i32, %arg1: memref<1x16x16xf32, #tpu.memory_space<vmem>>, %arg2: memref<2xf32, #tpu.memory_space<smem>>, %arg3: memref<1x3x16x16xf32, #tpu.memory_space<vmem>>) attributes {dimension_semantics = [#tpu.dimension_semantics<parallel>], iteration_bounds = array<i64: 2>, scalar_prefetch = 0 : i64, scratch_operands = 0 : i64, tpu.core_type = #tpu.core_type<tc>, window_params = [{transform_indices = @transform_0, window_bounds = array<i64: 1, 16, 16>}, {transform_indices = @transform_1, window_bounds = array<i64: 2>}, {transform_indices = @transform_2, window_bounds = array<i64: 1, 3, 16, 16>}]} {
    %c0 = arith.constant 0 : index
    %0 = memref.load %arg2[%c0] : memref<2xf32, #tpu.memory_space<smem>>
    %c1 = arith.constant 1 : index
    %1 = memref.load %arg2[%c1] : memref<2xf32, #tpu.memory_space<smem>>
    %c0_0 = arith.constant 0 : index
    %c0_1 = arith.constant 0 : index
    %c0_2 = arith.constant 0 : index
    %2 = vector.load %arg1[%c0_0, %c0_1, %c0_2] : memref<1x16x16xf32, #tpu.memory_space<vmem>>, vector<1x16x16xf32>
    %3 = vector.broadcast %0 : f32 to vector<1x16x16xf32>
    %4 = arith.subf %2, %3 : vector<1x16x16xf32>
    %5 = vector.broadcast %1 : f32 to vector<1x16x16xf32>
    %6 = arith.mulf %4, %5 : vector<1x16x16xf32>
    %7 = vector.shape_cast %6 : vector<1x16x16xf32> to vector<1x1x16x16xf32>
    %8 = vector.shape_cast %7 : vector<1x1x16x16xf32> to vector<1x1x16x16xf32>
    %9 = vector.broadcast %8 : vector<1x1x16x16xf32> to vector<1x3x16x16xf32>
    %c0_3 = arith.constant 0 : index
    %c0_4 = arith.constant 0 : index
    %c0_5 = arith.constant 0 : index
    %c0_6 = arith.constant 0 : index
    %10 = vector.load %arg3[%c0_3, %c0_4, %c0_5, %c0_6] : memref<1x3x16x16xf32, #tpu.memory_space<vmem>>, vector<1x3x16x16xf32>
    tpu.vector_store %arg3[%c0_3, %c0_4, %c0_5, %c0_6], %9 {strides = array<i32>} : memref<1x3x16x16xf32, #tpu.memory_space<vmem>>, vector<1x3x16x16xf32>,
    return
  }
  func.func @transform_0(%arg0: i32) -> (i32, i32, i32) {
    %c0_i32 = arith.constant 0 : i32
    %c0_i32_0 = arith.constant 0 : i32
    %c0_i32_1 = arith.constant 0 : i32
    return %arg0, %c0_i32, %c0_i32_0 : i32, i32, i32
  }
  func.func @transform_1(%arg0: i32) -> i32 {
    %c0_i32 = arith.constant 0 : i32
    %c0_i32_0 = arith.constant 0 : i32
    return %c0_i32 : i32
  }
  func.func @transform_2(%arg0: i32) -> (i32, i32, i32, i32) {
    %c0_i32 = arith.constant 0 : i32
    %c0_i32_0 = arith.constant 0 : i32
    %c0_i32_1 = arith.constant 0 : i32
    %c0_i32_2 = arith.constant 0 : i32
    return %arg0, %c0_i32, %c0_i32_0, %c0_i32_1 : i32, i32, i32, i32
  }
}

</mosaic_0001>

<bundles_post_ra>
// kernel: sobel_edge.3
= control target key start
LH: loop header
LB: loop body
LE: loop exit
PB: predicated region body
PF: predicated region fallthrough
CT: control target
= control target key end

     0   :  { %7 = vsyncpa [#allocation4], 0  ;;  %s520_s0 = inlined_call_operand.vmem [shape: f32[2,16,16], index: 0, kind: input, shape index: {}]   ;;  %s521_s1 = inlined_call_operand.vmem [shape: f32[2], index: 1, kind: input, shape index: {}]   ;;  %s522_s2 = inlined_call_operand.hbm [shape: f32[2,3,16,16], index: 2, kind: output, shape index: {}]  }
   0x1   :  { %8 = vsyncpa [#allocation3], 0 }
   0x2   :  { %10 = vsyncpa [#allocation3 + $0x1], 0  ;;  %s431_s9 = smov 0   ;;  %s433_s10 = smov 0  }
   0x3   :  { %s435_s11 = smov 0   ;;  %s437_s12 = smov 0  }
   0x4 LB: > { %s452_s13 = sadd.s32 4294967295, %s411_s12   ;;  %s263_s14 = sadd.s32 4294967294, %s411_s12   ;;  %s411_s12 = sphi %s437_s12, %s528_s12   ;;  %s407_s11 = sphi %s435_s11, %s527_s11   ;;  %s403_s10 = sphi %s433_s10, %s526_s10   ;;  %s399_s9 = sphi %s431_s9, %s525_s9  }
   0x5   : > { %s456_s15 = sadd.s32 1, %s411_s12   ;;  %s70_s16 = sadd.s32 1, %s407_s11 }
   0x6   : > { %s67_s17 = ssub.s32 %s411_s12, %s456_s15  ;;  %p80_p0 = scmp.ne.s32.totalorder %s407_s11, %s403_s10 }
   0x7   : > { %p68_p1 = scmp.eq.s32.totalorder %s67_s17, 0  ;;  %p81_p2 = scmp.eq.s32.totalorder %s452_s13, 1 }
   0x8   : > { %p86_p3 = scmp.ne.s32.totalorder %s403_s10, %s399_s9  ;;  %p87_p4 = scmp.eq.s32.totalorder %s263_s14, 1 }
   0x9   : > { %s467_s18 = scalar_select %p68_p1, %s407_s11, %s70_s16  }
   0xa   : > { %p469_p5 = por %p81_p2, %p80_p0  ;;  %p473_p6 = por %p87_p4, %p86_p3 }
   0xb   : > { %p264_p7 = scmp.ge.s32.totalorder %s411_s12, 1  ;;  %p94_p8 = scmp.lt.s32.totalorder %s411_s12, 3 }
   0xc   : > { %p292_p9 = scmp.eq.s32.totalorder %s452_s13, 0  ;;  %s106_s23 = sshll.u32 %s521_s1, 4  ;;  %s107_s23 = int_to_ptr.vmem [resolvable:$true] %s106_s23 }
   0xd   : > { %p95_p10 = pnand %p264_p7, %p94_p8  ;;  %s413_s24 = smov [#allocation2]  }
   0xf   : > { %p284_p11 = pneg %p95_p10  ;;  %127 = sbr.rel (%p95_p10) target bundleno = 44 (0x2c), region = 28 }
  0x11   : > { %p285_p12 = pnand %p292_p9, %p284_p11 }
  0x13   : > { %287 = dma.vmem_to_smem (!%p285_p12), %s107_s23, 16, %s413_s24, [#allocation4]  }
  0x14   : > { %390 = dma.done.wait (%p292_p9), [#allocation4], 16  }
  0x15   : > { %392 = vsyncadd (%p292_p9), [#allocation4], 4294967280 }
  0x16   : > { %134 = sfence }
  0x17   : > { %p151_p13 = scmp.lt.s32.totalorder %s452_s13, 1  ;;  %s148_s25 = sand.u32 1, %s403_s10   ;;  %vm166_vm0 = vcmask 130048  }
  0x18   : > { %s156_s26 = sld [smem:[#allocation2]]  ;;  %s276_s29 = smul.u32 48, %s148_s25 }
  0x19   : > { %s152_s27 = scalar_select %p151_p13, %s452_s13, 1 }
  0x1a   : > { %s271_s28 = sld [smem:[#allocation2 + $0x1]]  ;;  %s277_s6 = smul.u32 48, %s452_s13 }
  0x1b   : > { %s275_s30 = sshll.u32 %s152_s27, 4  ;;  %s150_s16 = scalar_lea.vmem [#allocation5], %s276_s29 }
  0x1c   : > { %s155_s5 = scalar_lea.vmem %s520_s0, %s275_s30  ;;  %s185_s14 = scalar_lea.hbm %s522_s2, %s277_s6 }
  0x1d   : > { %v158_v0 = vld [vmem:[%s155_s5] sm:$0xff]  ;;  %v159_v1 = vld [vmem:[%s155_s5 + $0x8] sm:$0xff]  ;;  %s186_s17 = sshll.u32 %s150_s16, 4  ;;  %s188_s21 = sshll.u32 %s185_s14, 4  ;;  %s187_s17 = int_to_ptr.vmem [resolvable:$true] %s186_s17  ;;  %s189_s21 = int_to_ptr.hbm [resolvable:$true] %s188_s21 }
  0x1e   : > { %v160_v2 = vstv %s156_s26  ;;  %s174_s13 = scalar_lea.sflag [#allocation3], %s148_s25  ;;  %s359_s22 = sshra.s32 %s189_s21, 4  ;;  %s360_s22 = int_to_ptr.hbm [resolvable:$true] %s359_s22 }
  0x1f   : > { %v161_v3 = vsub.f32 %v158_v0, %v160_v2  ;;  %v162_v4 = vsub.f32 %v159_v1, %v160_v2  ;;  %s361_s23 = scalar_lea.hbm %s360_s22, 48  ;;  %s365_s27 = scalar_lea.hbm %s522_s2, 96 }
  0x20   : > { %v163_v5 = vstv %s271_s28  ;;  %p362_p0 = scmp.ne.s32.totalorder %s360_s22, %s361_s23  ;;  %p366_p3 = scmp.lt.s32.totalorder %s360_s22, %s522_s2 }
  0x21   : > { %v164_v6 = vmul.f32 %v163_v5, %v161_v3  ;;  %v165_v7 = vmul.f32 %v163_v5, %v162_v4  ;;  %p367_p4 = scmp.lt.s32.totalorder %s365_s27, %s361_s23 }
  0x22   : > { %p363_p1 = pnand %p362_p0, %p469_p5 }
  0x23   : > { %167 = vst.msk [vmem:[%s150_s16] sm:$0xff] %vm166_vm0, %v164_v6  ;;  %p368_p7 = por %p367_p4, %p366_p3 }
  0x24   : > { %169 = vst.msk [vmem:[%s150_s16 + $0x10] sm:$0xff] %vm166_vm0, %v164_v6  ;;  %p364_p2 = pneg %p363_p1 }
  0x25   : > { %171 = vst.msk [vmem:[%s150_s16 + $0x20] sm:$0xff] %vm166_vm0, %v164_v6 }
  0x26   : > { %168 = vst.msk [vmem:[%s150_s16 + $0x8] sm:$0xff] %vm166_vm0, %v165_v7  ;;  %p369_p8 = pnand %p368_p7, %p364_p2 }
  0x27   : > { %170 = vst.msk [vmem:[%s150_s16 + $0x18] sm:$0xff] %vm166_vm0, %v165_v7 }
  0x28   : > { %172 = vst.msk [vmem:[%s150_s16 + $0x28] sm:$0xff] %vm166_vm0, %v165_v7 }
  0x29   : > { %372 = shalt.err (!%p369_p8)
}
  0x2a   : > { %s414_s25 = smov 128   ;;  %s415_s30 = smov 8  }
  0x2b   : > { %282 = dma.vmem_to_hbm [thread:$0]  (%p469_p5), %s187_s17, 768, %s189_s21, %s174_s13, %s414_s25, %s414_s25, %s415_s30  }
  0x2c PF: > { %p294_p9 = scmp.ge.s32.totalorder %s411_s12, 2  ;;  %s203_s3 = sand.u32 1, %s399_s9  }
  0x2d   : > { %s204_s4 = scalar_lea.sflag [#allocation3], %s203_s3 }
  0x2e   : > { %p289_p10 = pnand %p294_p9, %p473_p6 }
  0x30   : > { %p290_p11 = pneg %p289_p10 }
  0x32   : > { %394 = dma.done.wait (%p290_p11), %s204_s4, 768  }
  0x33   : > { %396 = vsyncadd (%p290_p11), %s204_s4, 4294966528  ;;  %p13_p12 = scmp.ge.s32.totalorder %s456_s15, 4   ;;  %s525_s9 = smov %s403_s10 }
  0x34   : > { %s526_s10 = smov %s407_s11  ;;  %s527_s11 = smov %s467_s18 }
  0x35   : > { %s528_s12 = smov %s456_s15  ;;  %15 = sbr.rel (!%p13_p12) target bundleno = 4 (0x4), region = 68 }
  0x3a   :  { %210 = vsyncpa [#allocation3], 1 }
  0x3b   :  { %212 = vsyncpa [#allocation3 + $0x1], 1 }
  0x3c   :  { %213 = vsyncpa [#allocation4], 1 }
  0x3d   :  { %215 = vsyncpa [#allocation4 + $0x1], 1 }

// kernel: sobel_edge.2
= control target key start
LH: loop header
LB: loop body
LE: loop exit
PB: predicated region body
PF: predicated region fallthrough
CT: control target
= control target key end

     0   :  { %9 = vsyncpa [#allocation3], 0  ;;  %s738_s0 = inlined_call_operand.hbm [shape: f32[2,3,16,16], index: 0, kind: input, shape index: {}]   ;;  %s739_s1 = inlined_call_operand.vmem [shape: f32[2,16,16], index: 1, kind: output, shape index: {0}]   ;;  %s740_s2 = inlined_call_operand.vmem [shape: f32[2,1,1], index: 2, kind: output, shape index: {1}]   ;;  %s741_s3 = inlined_call_operand.vmem [shape: f32[2,1,1], index: 3, kind: output, shape index: {2}]  }
   0x1   :  { %11 = vsyncpa [#allocation3 + $0x1], 0  ;;  %s625_s12 = smov 0   ;;  %s627_s13 = smov 0  }
   0x2   :  { %s629_s14 = smov 0   ;;  %s631_s15 = smov 0  }
   0x3 LB: > { %s644_s16 = sadd.s32 4294967295, %s599_s15   ;;  %s647_s17 = sadd.s32 1, %s599_s15   ;;  %s599_s15 = sphi %s631_s15, %s747_s15   ;;  %s595_s14 = sphi %s629_s14, %s746_s14   ;;  %s591_s13 = sphi %s627_s13, %s745_s13   ;;  %s587_s12 = sphi %s625_s12, %s744_s12  }
   0x4   : > { %s21_s18 = ssub.s32 %s599_s15, %s647_s17  ;;  %s24_s19 = sadd.s32 1, %s595_s14 }
   0x5   : > { %p22_p0 = scmp.eq.s32.totalorder %s21_s18, 0  ;;  %p31_p1 = scmp.ne.s32.totalorder %s595_s14, %s591_s13 }
   0x6   : > { %p32_p2 = scmp.eq.s32.totalorder %s599_s15, 0  ;;  %p37_p3 = scmp.ne.s32.totalorder %s591_s13, %s587_s12 }
   0x7   : > { %s657_s20 = scalar_select %p22_p0, %s595_s14, %s24_s19  }
   0x8   : > { %p33_p4 = por %p32_p2, %p31_p1  ;;  %p38_p5 = scmp.eq.s32.totalorder %s644_s16, 0 }
   0x9   : > { %p494_p6 = scmp.lt.s32.totalorder %s599_s15, 2  ;;  %s139_s22 = sand.u32 1, %s595_s14  }
   0xa   : > { %p661_p7 = por %p38_p5, %p37_p3  ;;  %s485_s23 = smul.u32 48, %s139_s22 }
   0xb   : > { %s486_s24 = smul.u32 48, %s599_s15  ;;  %p667_p8 = pnand %p494_p6, %p33_p4 }
   0xc   : > { %s143_s29 = scalar_lea.vmem [#allocation2], %s485_s23  ;;  %p479_p9 = scmp.ge.s32.totalorder %s599_s15, 1 }
   0xd   : > { %s148_s28 = scalar_lea.hbm %s738_s0, %s486_s24  ;;  %s151_s30 = sshll.u32 %s143_s29, 4  ;;  %s152_s30 = int_to_ptr.vmem [resolvable:$true] %s151_s30 }
   0xe   : > { %s149_s4 = sshll.u32 %s148_s28, 4  ;;  %s140_s5 = scalar_lea.sflag [#allocation3], %s139_s22  ;;  %s150_s4 = int_to_ptr.hbm [resolvable:$true] %s149_s4 }
   0xf   : > { %s535_s6 = sshra.s32 %s150_s4, 4  ;;  %p539_p11 = pneg %p667_p8  ;;  %s536_s6 = int_to_ptr.hbm [resolvable:$true] %s535_s6 }
  0x10   : > { %s537_s7 = scalar_lea.hbm %s536_s6, 48  ;;  %s542_s10 = scalar_lea.hbm %s738_s0, 96 }
  0x11   : > { %p538_p10 = scmp.ne.s32.totalorder %s536_s6, %s537_s7  ;;  %p543_p0 = scmp.lt.s32.totalorder %s536_s6, %s738_s0 }
  0x12   : > { %p544_p1 = scmp.lt.s32.totalorder %s542_s10, %s537_s7 }
  0x13   : > { %p540_p12 = pnand %p539_p11, %p538_p10 }
  0x14   : > { %p545_p2 = por %p544_p1, %p543_p0 }
  0x15   : > { %p541_p13 = pneg %p540_p12 }
  0x17   : > { %p546_p3 = pnand %p545_p2, %p541_p13 }
  0x19   : > { %549 = shalt.err (!%p546_p3)
}
  0x1a   : > { %s601_s18 = smov 128   ;;  %s602_s19 = smov 8  }
  0x1b   : > { %493 = dma.hbm_to_vmem [thread:$0]  (!%p667_p8), %s150_s4, 768, %s152_s30, %s140_s5, %s601_s18, %s601_s18, %s602_s19  }
  0x1c   : > { %p159_p4 = scmp.lt.s32.totalorder %s599_s15, 3 }
  0x1e   : > { %p160_p5 = pnand %p479_p9, %p159_p4 }
  0x1f   : > { %s165_s22 = sand.u32 (!%p160_p5), 1, %s591_s13  }
  0x20   : > { %163 = sbr.rel (%p160_p5) target bundleno = 349 (0x15d), region = 24  ;;  %s166_s24 = scalar_lea.sflag (!%p160_p5), [#allocation3], %s165_s22 }
  0x21   : > { %s487_s23 = smul.u32 (!%p160_p5), 48, %s165_s22 }
  0x23   : > { %s169_s26 = scalar_lea.vmem (!%p160_p5), [#allocation2], %s487_s23 }
  0x25   : > { %582 = dma.done.wait (%p661_p7), %s166_s24, 768  }
  0x26   : > { %584 = vsyncadd (%p661_p7), %s166_s24, 4294966528  ;;  %vm216_vm0 = vcmask 130048   ;;  %v210_v0 = vld [vmem:[%s169_s26] sm:$0xff]  ;;  %v211_v1 = vld [vmem:[%s169_s26 + $0x8] sm:$0xff]  ;;  %vm229_vm1 = vcmask 1040384   ;;  %vm236_vm2 = vcmask 1046528  }
  0x27   : > { %v212_v2 = vld [vmem:[%s169_s26 + $0x10] sm:$0xff]  ;;  %v213_v3 = vld [vmem:[%s169_s26 + $0x18] sm:$0xff]  ;;  %v214_v4 = vld [vmem:[%s169_s26 + $0x20] sm:$0xff]  ;;  %v217_v6 = vsel %vm216_vm0, %v210_v0, 0.0  ;;  %v222_v8 = vsel %vm216_vm0, %v211_v1, 0.0  ;;  %s603_s15 = smov 1  }
  0x28   : > { %v215_v5 = vld [vmem:[%s169_s26 + $0x28] sm:$0xff]  ;;  %v218_v7 = vsel %vm216_vm0, %v212_v2, 0.0  ;;  %v220_v10 = vsel %vm216_vm0, %v214_v4, 0.0  ;;  %v223_v11 = vsel %vm216_vm0, %v213_v3, 0.0  ;;  %s604_s21 = smov 127   ;;  %vm259_vm3 = vcmask 7168  }
  0x29   : > { %v219_v9 = vadd.f32 %v218_v7, %v217_v6  ;;  %v225_v12 = vsel %vm216_vm0, %v215_v5, 0.0  ;;  %v224_v13 = vadd.f32 %v223_v11, %v222_v8  ;;  %vm268_vm4 = vcmask 121856   ;;  %p199_p6 = scmp.lt.s32.totalorder %s644_s16, 1 }
  0x2a   : > { %vm355_vm9 = vcmask 0  }
  0x2b   : > { %v221_v14 = vadd.f32 %v220_v10, %v219_v9  ;;  %v226_v15 = vadd.f32 %v225_v12, %v224_v13  ;;  %s749_s16 = smov (!%p199_p6, %s644_s16), 1 }
  0x2c   : > { %s484_s25 = sshll.u32 %s749_s16, 4  ;;  %s206_s5 = scalar_lea.vmem %s740_s2, %s749_s16 }
  0x2d   : > { %v230_v16 = vrot.slane %v221_v14, 7  ;;  %v237_v17 = vrot.slane %v221_v14, 1  ;;  %v243_v18 = vmul.f32 2.0, %v221_v14  ;;  %v238_v19 = vrot.slane %v226_v15, 1  ;;  %s203_s29 = scalar_lea.vmem %s739_s1, %s484_s25  ;;  %s209_s8 = scalar_lea.vmem %s741_s3, %s749_s16 }
  0x2e   : > { %v231_v20 = vrot.slane %v226_v15, 7  ;;  %v244_v24 = vmul.f32 2.0, %v226_v15 }
  0x2f   : > { %v235_v21 = vsel %vm229_vm1, 0.0, %v230_v16  ;;  %v239_v22 = vsel %vm236_vm2, %v237_v17, %v238_v19  ;;  %v242_v28 = vsel %vm236_vm2, %v238_v19, 0.0 }
  0x30   : > { %v245_v23 = vadd.f32 %v243_v18, %v235_v21  ;;  %v249_v25 = vsub.f32 %v235_v21, %v239_v22  ;;  %v232_v26 = vsel %vm229_vm1, %v230_v16, %v231_v20 }
  0x31   : > { %v246_v29 = vadd.f32 %v244_v24, %v232_v26  ;;  %v250_v30 = vsub.f32 %v232_v26, %v242_v28 }
  0x32   : > { %v247_v27 = vadd.f32 %v245_v23, %v239_v22  ;;  %273 = vrot.lane.b32.xlu0 %v249_v25, %s603_s15  ;;  %v291_v38 = vmul.f32 2.0, %v249_v25 }
  0x33   : > { %v248_v31 = vadd.f32 %v246_v29, %v242_v28  ;;  %v292_v42 = vmul.f32 2.0, %v250_v30 }
  0x34   : > { %253 = vrot.lane.b32.xlu1 %v247_v27, %s603_s15  ;;  %262 = vrot.lane.b32.xlu2 %v247_v27, %s604_s21 }
  0x3a   : > { %275 = vrot.lane.b32.xlu0 %v250_v30, %s603_s15 }
  0x3c   : > { %255 = vrot.lane.b32.xlu1 %v248_v31, %s603_s15  ;;  %264 = vrot.lane.b32.xlu2 %v248_v31, %s604_s21 }
  0x42   : > { %281 = vrot.lane.b32.xlu0 %v249_v25, %s604_s21 }
  0x44   : > { %283 = vrot.lane.b32.xlu1 %v250_v30, %s604_s21 }
  0x8e   : > { %v263_v34 = vpop.permute.xlu2 %262 }
  0x8f   : > { %v269_v41 = vsel %vm268_vm4, %v263_v34, 0.0 }
  0x96   : > { %v265_v37 = vpop.permute.xlu2 %264 }
  0x97   : > { %v270_v45 = vsel %vm268_vm4, %v265_v37, 0.0 }
  0xa4   : > { %v274_v32 = vpop.permute.xlu0 %273 }
  0xa5   : > { %v279_v39 = vsel %vm259_vm3, 0.0, %v274_v32 }
  0xa6   : > { %v254_v33 = vpop.permute.xlu1 %253  ;;  %v293_v46 = vadd.f32 %v291_v38, %v279_v39 }
  0xa7   : > { %v260_v40 = vsel %vm259_vm3, 0.0, %v254_v33 }
  0xa8   : > { %v289_v47 = vsub.f32 %v260_v40, %v269_v41 }
  0xaa   : > { %v297_v56 = vmul.f32 %v289_v47, %v289_v47 }
  0xac   : > { %v276_v35 = vpop.permute.xlu0 %275 }
  0xad   : > { %v280_v43 = vsel %vm259_vm3, 0.0, %v276_v35 }
  0xae   : > { %v256_v36 = vpop.permute.xlu1 %255  ;;  %v294_v49 = vadd.f32 %v292_v42, %v280_v43 }
  0xaf   : > { %v261_v44 = vsel %vm259_vm3, 0.0, %v256_v36 }
  0xb0   : > { %v290_v51 = vsub.f32 %v261_v44, %v270_v45 }
  0xb2   : > { %v298_v58 = vmul.f32 %v290_v51, %v290_v51 }
  0xb4   : > { %v282_v48 = vpop.permute.xlu0 %281 }
  0xb5   : > { %v287_v50 = vsel %vm268_vm4, %v282_v48, 0.0 }
  0xb6   : > { %v284_v52 = vpop.permute.xlu1 %283  ;;  %v295_v53 = vadd.f32 %v293_v46, %v287_v50 }
  0xb7   : > { %v288_v54 = vsel %vm268_vm4, %v284_v52, 0.0 }
  0xb8   : > { %v296_v55 = vadd.f32 %v294_v49, %v288_v54  ;;  %v299_v57 = vmul.f32 %v295_v53, %v295_v53 }
  0xba   : > { %v300_v59 = vmul.f32 %v296_v55, %v296_v55  ;;  %v301_v60 = vadd.f32 %v299_v57, %v297_v56 }
  0xbc   : > { %v302_v61 = vadd.f32 %v300_v59, %v298_v58  ;;  %531 = vrsqrt.f32 %v301_v60  ;;  %vm310_vm5 = vcmp.eq.f32.partialorder %v301_v60, inf  ;;  %v313_v11 = vand.u32 2147483648, %v301_v60 }
  0xbd   : > { %vm312_vm6 = vcmp.eq.f32.partialorder %v301_v60, 0.0 }
  0xbe   : > { %533 = vrsqrt.f32 %v302_v61  ;;  %vm322_vm7 = vcmp.eq.f32.partialorder %v302_v61, inf  ;;  %v325_v14 = vand.u32 2147483648, %v302_v61  ;;  %vm324_vm8 = vcmp.eq.f32.partialorder %v302_v61, 0.0 }
  0xc2   : > { %v532_v62 = vpop.eup %531 }
  0xc3   : > { %v304_v0 = vmul.f32 %v532_v62, %v301_v60 }
  0xc4   : > { %v534_v63 = vpop.eup %533 }
  0xc5   : > { %v316_v1 = vmul.f32 %v534_v63, %v302_v61  ;;  %v305_v2 = vmul.f32 %v532_v62, %v304_v0 }
  0xc7   : > { %v317_v3 = vmul.f32 %v534_v63, %v316_v1  ;;  %v306_v4 = vmul.f32 0.5, %v305_v2 }
  0xc9   : > { %v318_v5 = vmul.f32 0.5, %v317_v3  ;;  %v307_v6 = vsub.f32 1.5, %v306_v4 }
  0xcb   : > { %v319_v7 = vsub.f32 1.5, %v318_v5  ;;  %v308_v8 = vmul.f32 %v532_v62, %v307_v6 }
  0xcd   : > { %v320_v9 = vmul.f32 %v534_v63, %v319_v7  ;;  %v309_v10 = vmul.f32 %v308_v8, %v301_v60 }
  0xcf   : > { %v321_v12 = vmul.f32 %v320_v9, %v302_v61  ;;  %v311_v13 = vsel %vm310_vm5, %v301_v60, %v309_v10 }
  0xd0   : > { %v314_v15 = vsel %vm312_vm6, %v313_v11, %v311_v13 }
  0xd1   : > { %v323_v16 = vsel %vm322_vm7, %v302_v61, %v321_v12  ;;  %327 = vst.msk [vmem:[%s203_s29] sm:$0xff] %vm216_vm0, %v314_v15  ;;  %v329_v17 = vsel %vm216_vm0, %v314_v15, inf  ;;  %v342_v18 = vsel %vm216_vm0, %v314_v15, -inf }
  0xd2   : > { %v326_v19 = vsel %vm324_vm8, %v325_v14, %v323_v16  ;;  %330 = vmin.xlane.f32.xlu2 %v329_v17  ;;  %343 = vmax.xlane.f32.xlu1 %v342_v18 }
  0xd3   : > { %v332_v20 = vsel %vm216_vm0, %v326_v19, inf  ;;  %328 = vst.msk [vmem:[%s203_s29 + $0x8] sm:$0xff] %vm216_vm0, %v326_v19  ;;  %v345_v21 = vsel %vm216_vm0, %v326_v19, -inf }
  0xd4   : > { %333 = vmin.xlane.f32.xlu0 %v332_v20 }
  0xda   : > { %346 = vmax.xlane.f32.xlu2 %v345_v21 }
 0x145   : > { %v331_v22 = vpop.xlane.xlu2 %330  ;;  %v344_v27 = vpop.xlane.xlu1 %343 }
 0x147   : > { %v334_v23 = vpop.xlane.xlu0 %333 }
 0x148   : > { %v335_v24 = vmin.f32 %v331_v22, %v334_v23 }
 0x14a   : > { %v336_v25 = vrot.slane %v335_v24, 4 }
 0x14c   : > { %v337_v26 = vmin.f32 %v335_v24, %v336_v25 }
 0x14d   : > { %v347_v29 = vpop.xlane.xlu2 %346 }
 0x14e   : > { %v338_v28 = vrot.slane %v337_v26, 2  ;;  %v348_v30 = vmax.f32 %v344_v27, %v347_v29 }
 0x150   : > { %v339_v31 = vmin.f32 %v337_v26, %v338_v28  ;;  %v349_v32 = vrot.slane %v348_v30, 4 }
 0x152   : > { %v340_v33 = vrot.slane %v339_v31, 1  ;;  %v350_v34 = vmax.f32 %v348_v30, %v349_v32 }
 0x154   : > { %v341_v35 = vmin.f32 %v339_v31, %v340_v33  ;;  %v351_v36 = vrot.slane %v350_v34, 2 }
 0x156   : > { %356 = vst.msk [vmem:[%s206_s5] sm:$0x1] %vm355_vm9, %v341_v35  ;;  %v352_v37 = vmax.f32 %v350_v34, %v351_v36 }
 0x158   : > { %v353_v38 = vrot.slane %v352_v37, 1 }
 0x15a   : > { %v354_v39 = vmax.f32 %v352_v37, %v353_v38 }
 0x15c   : > { %357 = vst.msk [vmem:[%s209_s8] sm:$0x1] %vm355_vm9, %v354_v39 }
 0x15d PF: > { %p14_p7 = scmp.ge.s32.totalorder %s647_s17, 4   ;;  %s744_s12 = smov %s591_s13 }
 0x15e   : > { %s745_s13 = smov %s595_s14  ;;  %s746_s14 = smov %s657_s20 }
 0x15f   : > { %s747_s15 = smov %s647_s17  ;;  %16 = sbr.rel (!%p14_p7) target bundleno = 3 (0x3), region = 88 }
 0x164   :  { %403 = vsyncpa [#allocation3], 1 }
 0x165   :  { %405 = vsyncpa [#allocation3 + $0x1], 1 }

</bundles_post_ra>
